<compile_context>
chip_gen: v6e
topology: v6e:2x2x1
jax: 0.10.0
libtpu: 0.0.40
codegen_flags: <defaults>
</compile_context>

<pallas_src>
import math

import jax
import jax.numpy as jnp
from jax.experimental import pallas as pl
from jax.experimental.pallas import tpu as pltpu


def _chunk_sizes(size: int, chunks: int):
    """torch.chunk semantics: chunk size = ceil(size/chunks); the last chunk may
    be smaller, and fewer than `chunks` chunks may be returned."""
    if size == 0:
        return [0]
    chunk_size = math.ceil(size / chunks)
    n = math.ceil(size / chunk_size)
    return [chunk_size] * (n - 1) + [size - chunk_size * (n - 1)]


def _vmem_capacity_bytes() -> int:
    try:
        return int(pltpu.get_tpu_info().vmem_capacity_bytes)
    except Exception:
        return 64 << 20  # conservative: v7x per-TC VMEM


def _target_block_bytes(vmem_cap: int) -> int:
    # input block + output blocks (~= input bytes), double-buffered ~= 4x one
    # block; keep one block <= ~cap/8 so everything + Mosaic scratch fits.
    return max(1 << 20, min(vmem_cap // 8, 12 << 20))


def _pick_block_rows(pre: int, row_bytes: int, target_bytes: int) -> int:
    """Sublane-aligned (multiple of 8, or full-extent when pre<=8) row-block
    size under the VMEM budget; no divisibility requirement (cdiv grid)."""
    if pre <= 8:
        return pre  # full extent is always a legal block dim
    max_rows = max(8, (target_bytes // max(1, row_bytes)) // 8 * 8)
    bp = min(max_rows, (pre // 8) * 8)
    if bp >= pre:
        # whole array would be one block: split into >=2 grid steps so the
        # "parallel" axis can shard across v7x's two TensorCores.
        bp = max(8, ((pre + 1) // 2) // 8 * 8)
    return bp


def _vmem_limit(in_block_bytes: int, vmem_cap: int) -> int:
    need = int(4 * in_block_bytes * 1.25) + (4 << 20)  # in+outs, 2x buffered, slack
    return min(max(need, 16 << 20), int(vmem_cap * 0.9))


def _fork_chunk_2d(x, pre, C, post, sizes, offsets, itemsize, target, vmem_cap):
    """Lane-dense 2-D view (pre, C*post); grid over row blocks only."""
    W = C * post
    x2 = x.reshape(pre, W)
    lane_bounds = [(o * post, (o + s) * post) for o, s in zip(offsets, sizes)]

    row_bytes = W * itemsize
    bp = _pick_block_rows(pre, row_bytes, target)
    grid = (pl.cdiv(pre, bp),)

    def kernel(x_ref, *out_refs):
        for o_ref, (lo, hi) in zip(out_refs, lane_bounds):
            o_ref[...] = x_ref[:, lo:hi]

    in_specs = [pl.BlockSpec((bp, W), lambda i: (i, 0))]
    out_shapes = tuple(jax.ShapeDtypeStruct((pre, s * post), x.dtype) for s in sizes)
    out_specs = tuple(pl.BlockSpec((bp, s * post), lambda i: (i, 0)) for s in sizes)

    outs = pl.pallas_call(
        kernel,
        out_shape=out_shapes,
        grid=grid,
        in_specs=in_specs,
        out_specs=out_specs,
        compiler_params=pltpu.CompilerParams(
            dimension_semantics=("parallel",),
            vmem_limit_bytes=_vmem_limit(bp * row_bytes, vmem_cap),
        ),
    )(x2)
    return list(outs)


def _fork_chunk_3d(x, pre, C, post, sizes, offsets, itemsize, target, vmem_cap):
    """Wide rows: 3-D view (pre, C, post) with lane tiling of `post` (multiples
    of 128).  Output writes are full lane-dense blocks; chunk extraction is a
    static slice of the full-extent channel dim of the input block."""
    x3 = x.reshape(pre, C, post)
    chan_bounds = [(o, o + s) for o, s in zip(offsets, sizes)]

    bp = pre if pre < 8 else 8
    per_lane_bytes = C * bp * itemsize
    max_lanes = max(128, (target // max(1, per_lane_bytes)) // 128 * 128)
    pt = min(max_lanes, (post // 128) * 128)
    grid = (pl.cdiv(pre, bp), pl.cdiv(post, pt))

    def kernel(x_ref, *out_refs):
        for o_ref, (lo, hi) in zip(out_refs, chan_bounds):
            o_ref[...] = x_ref[:, lo:hi, :]

    in_specs = [pl.BlockSpec((bp, C, pt), lambda i, j: (i, 0, j))]
    out_shapes = tuple(jax.ShapeDtypeStruct((pre, s, post), x.dtype) for s in sizes)
    out_specs = tuple(pl.BlockSpec((bp, s, pt), lambda i, j: (i, 0, j)) for s in sizes)

    outs = pl.pallas_call(
        kernel,
        out_shape=out_shapes,
        grid=grid,
        in_specs=in_specs,
        out_specs=out_specs,
        compiler_params=pltpu.CompilerParams(
            dimension_semantics=("parallel", "parallel"),
            vmem_limit_bytes=_vmem_limit(bp * C * pt * itemsize, vmem_cap),
        ),
    )(x3)
    return list(outs)


def fork_chunk(x: jax.Array, chunks: int = 2, dim: int = 1):
    """Pallas equivalent of ForkChunk.forward: tuple of chunks of x split along
    `dim` with torch.chunk semantics."""
    dim = dim % x.ndim
    C = x.shape[dim]
    sizes = _chunk_sizes(C, chunks)
    offsets = [0]
    for s in sizes[:-1]:
        offsets.append(offsets[-1] + s)

    pre = math.prod(x.shape[:dim])
    post = math.prod(x.shape[dim + 1:])
    out_full_shapes = [
        tuple(x.shape[:dim]) + (s,) + tuple(x.shape[dim + 1:]) for s in sizes
    ]

    # Degenerate shapes: nothing to copy.
    if x.size == 0:
        return tuple(jnp.zeros(shp, x.dtype) for shp in out_full_shapes)

    itemsize = x.dtype.itemsize
    vmem_cap = _vmem_capacity_bytes()
    target = _target_block_bytes(vmem_cap)
    row_bytes = C * post * itemsize

    if row_bytes > target and post >= 128:
        outs = _fork_chunk_3d(x, pre, C, post, sizes, offsets, itemsize, target, vmem_cap)
    else:
        outs = _fork_chunk_2d(x, pre, C, post, sizes, offsets, itemsize, target, vmem_cap)

    # Un-fold back to the original layout (free reshape of contiguous dims).
    return tuple(o.reshape(shp) for o, shp in zip(outs, out_full_shapes))


if __name__ == "__main__":
    key = jax.random.PRNGKey(0)
    x = jax.random.normal(key, (2, 4, 16, 16), dtype=jnp.float32)

    # ForkChunk(chunks=2, dim=1)
    outs = fork_chunk(x, chunks=2, dim=1)
    outs = jax.block_until_ready(outs)

    refs = jnp.split(x, 2, axis=1)
    assert len(outs) == 2
    for o, r in zip(outs, refs):
        assert o.shape == r.shape and o.dtype == r.dtype
        assert bool(jnp.array_equal(o, r))  # exact copy -> exact equality

    # Uneven split (torch.chunk semantics): C=5, chunks=2 -> sizes [3, 2]
    xu = jax.random.normal(jax.random.PRNGKey(0), (2, 5, 16, 16), jnp.float32)
    outs_u = jax.block_until_ready(fork_chunk(xu, chunks=2, dim=1))
    assert outs_u[0].shape == (2, 3, 16, 16) and outs_u[1].shape == (2, 2, 16, 16)
    assert bool(jnp.array_equal(outs_u[0], xu[:, :3]))
    assert bool(jnp.array_equal(outs_u[1], xu[:, 3:]))

    print("KERNEL_OK")
</pallas_src>

<mosaic_0001>
module attributes {stable_mosaic.version = 11 : i64} {
  func.func @kernel(%arg0: i32, %arg1: memref<2x1024xf32, #tpu.memory_space<vmem>>, %arg2: memref<2x512xf32, #tpu.memory_space<vmem>>, %arg3: memref<2x512xf32, #tpu.memory_space<vmem>>) attributes {dimension_semantics = [#tpu.dimension_semantics<parallel>], iteration_bounds = array<i64: 1>, scalar_prefetch = 0 : i64, scratch_operands = 0 : i64, tpu.core_type = #tpu.core_type<tc>, window_params = [{transform_indices = @transform_0, window_bounds = array<i64: 2, 1024>}, {transform_indices = @transform_1, window_bounds = array<i64: 2, 512>}, {transform_indices = @transform_2, window_bounds = array<i64: 2, 512>}]} {
    %c0 = arith.constant 0 : index
    %c0_0 = arith.constant 0 : index
    %0 = vector.load %arg1[%c0, %c0_0] : memref<2x1024xf32, #tpu.memory_space<vmem>>, vector<2x512xf32>
    %c0_1 = arith.constant 0 : index
    %c0_2 = arith.constant 0 : index
    %1 = vector.load %arg2[%c0_1, %c0_2] : memref<2x512xf32, #tpu.memory_space<vmem>>, vector<2x512xf32>
    tpu.vector_store %arg2[%c0_1, %c0_2], %0 {strides = array<i32>} : memref<2x512xf32, #tpu.memory_space<vmem>>, vector<2x512xf32>,
    %c0_3 = arith.constant 0 : index
    %c512 = arith.constant 512 : index
    %2 = vector.load %arg1[%c0_3, %c512] : memref<2x1024xf32, #tpu.memory_space<vmem>>, vector<2x512xf32>
    %c0_4 = arith.constant 0 : index
    %c0_5 = arith.constant 0 : index
    %3 = vector.load %arg3[%c0_4, %c0_5] : memref<2x512xf32, #tpu.memory_space<vmem>>, vector<2x512xf32>
    tpu.vector_store %arg3[%c0_4, %c0_5], %2 {strides = array<i32>} : memref<2x512xf32, #tpu.memory_space<vmem>>, vector<2x512xf32>,
    return
  }
  func.func @transform_0(%arg0: i32) -> (i32, i32) {
    %c0_i32 = arith.constant 0 : i32
    %c0_i32_0 = arith.constant 0 : i32
    return %arg0, %c0_i32 : i32, i32
  }
  func.func @transform_1(%arg0: i32) -> (i32, i32) {
    %c0_i32 = arith.constant 0 : i32
    %c0_i32_0 = arith.constant 0 : i32
    return %arg0, %c0_i32 : i32, i32
  }
  func.func @transform_2(%arg0: i32) -> (i32, i32) {
    %c0_i32 = arith.constant 0 : i32
    %c0_i32_0 = arith.constant 0 : i32
    return %arg0, %c0_i32 : i32, i32
  }
}

</mosaic_0001>

<bundles_post_ra>
// kernel: tpu_custom_call.1
= control target key start
LH: loop header
LB: loop body
LE: loop exit
PB: predicated region body
PF: predicated region fallthrough
CT: control target
= control target key end

     0   :  { %8 = vsyncpa [#allocation3], 0  ;;  %s153_s0 = inlined_call_operand.hbm [shape: f32[2,1024], index: 0, kind: input, shape index: {}]   ;;  %s154_s1 = inlined_call_operand.hbm [shape: f32[2,512], index: 1, kind: output, shape index: {0}]   ;;  %s155_s2 = inlined_call_operand.hbm [shape: f32[2,512], index: 2, kind: output, shape index: {1}]  }
   0x1   :  { %9 = vsyncpa [#allocation4], 0 }
   0x2   :  { %10 = vsyncpa [#allocation7], 0  ;;  %s126_s9 = smov [#allocation2]  }
   0x3   :  { %s17_s10 = sshll.u32 %s126_s9, 4  ;;  %s18_s10 = int_to_ptr.vmem [resolvable:$true] %s17_s10 }
   0x4   :  { %s68_s11 = scalar_lea.vmem %s18_s10, 256  ;;  %p73_p1 = scmp.lt.s32.totalorder %s18_s10, %s18_s10 }
   0x5   :  { %p69_p0 = scmp.ne.s32.totalorder %s18_s10, %s68_s11  ;;  %p74_p2 = scmp.lt.s32.totalorder %s68_s11, %s68_s11 }
   0x7   :  { %p75_p3 = por %p74_p2, %p73_p1 }
   0x9   :  { %p76_p4 = pnand %p75_p3, %p69_p0 }
   0xb   :  { %79 = shalt.err (!%p76_p4)
}
   0xc   :  { %20 = dma.hbm_to_vmem [thread:$0]  %s153_s0, 256, %s18_s10, [#allocation3]  }
   0xd   :  { %120 = dma.done.wait [#allocation3], 256  }
   0xe   :  { %121 = vsyncadd [#allocation3], 4294967040  ;;  %s127_s14 = smov [#allocation5]   ;;  %s128_s16 = smov [#allocation6]   ;;  %v24_v0 = vld [vmem:[#allocation2] sm:$0xff]  ;;  %v26_v1 = vld [vmem:[#allocation2 + $0x8] sm:$0xff] }
   0xf   :  { %s34_s15 = sshll.u32 %s127_s14, 4  ;;  %s44_s17 = sshll.u32 %s128_s16, 4  ;;  %25 = vst [vmem:[#allocation5] sm:$0xff] %v24_v0  ;;  %27 = vst [vmem:[#allocation6] sm:$0xff] %v26_v1  ;;  %s35_s15 = int_to_ptr.vmem [resolvable:$true] %s34_s15  ;;  %s45_s17 = int_to_ptr.vmem [resolvable:$true] %s44_s17 }
  0x10   :  { %s80_s18 = scalar_lea.vmem %s35_s15, 128  ;;  %p85_p6 = scmp.lt.s32.totalorder %s35_s15, %s35_s15 }
  0x11   :  { %p81_p5 = scmp.ne.s32.totalorder %s35_s15, %s80_s18  ;;  %p86_p7 = scmp.lt.s32.totalorder %s80_s18, %s80_s18 }
  0x13   :  { %p87_p8 = por %p86_p7, %p85_p6 }
  0x15   :  { %p88_p9 = pnand %p87_p8, %p81_p5 }
  0x17   :  { %91 = shalt.err (!%p88_p9)
}
  0x18   :  { %37 = dma.vmem_to_hbm [thread:$0]  %s35_s15, 128, %s154_s1, [#allocation4]  }
  0x19   :  { %s100_s20 = scalar_lea.vmem %s45_s17, 128  ;;  %p105_p11 = scmp.lt.s32.totalorder %s45_s17, %s45_s17 }
  0x1a   :  { %p101_p10 = scmp.ne.s32.totalorder %s45_s17, %s100_s20  ;;  %p106_p12 = scmp.lt.s32.totalorder %s100_s20, %s100_s20 }
  0x1c   :  { %p107_p13 = por %p106_p12, %p105_p11 }
  0x1e   :  { %p108_p0 = pnand %p107_p13, %p101_p10 }
  0x20   :  { %111 = shalt.err (!%p108_p0)
}
  0x21   :  { %47 = dma.vmem_to_hbm [thread:$0]  %s45_s17, 128, %s155_s2, [#allocation7]  }
  0x22   :  { %122 = dma.done.wait [#allocation4], 128  }
  0x23   :  { %123 = vsyncadd [#allocation4], 4294967168 }
  0x24   :  { %124 = dma.done.wait [#allocation7], 128  }
  0x25   :  { %125 = vsyncadd [#allocation7], 4294967168 }
  0x26   :  { %54 = vsyncpa [#allocation3], 1 }
  0x27   :  { %55 = vsyncpa [#allocation4], 1 }
  0x28   :  { %56 = vsyncpa [#allocation7], 1 }

</bundles_post_ra>
